<compile_context>
chip_gen: v6e
topology: v6e:2x2x1
jax: 0.10.0
libtpu: 0.0.40
codegen_flags: <defaults>
</compile_context>

<pallas_src>
import functools

import jax
import jax.numpy as jnp
from jax.experimental import pallas as pl
from jax.experimental.pallas import tpu as pltpu

_SUBLANE = 8
_LANE = 128
_MIN_GRID_STEPS = 2       # keep >=2 grid steps so ("parallel",) can shard across v7x's 2 TCs
_VMEM_FRACTION = 0.6      # fraction of the scoped-VMEM limit the block working set may use

# MXU operand dtype.  f32 keeps parity with the f32 reference through the eigh calls;
# on v6e/v7x set to jnp.bfloat16 for ~2-4x MXU throughput + half the HBM/VMEM traffic
# (accumulation stays f32 via preferred_element_type) and re-validate tolerances.
_MXU_DTYPE = jnp.float32


def _round_up(x, m):
    return (x + m - 1) // m * m


def _padded_slab_bytes(rows, cols, itemsize=4):
    """VMEM bytes of one f32 (rows, cols) tile after (8, 128) sublane/lane padding."""
    return _round_up(max(rows, 1), _SUBLANE) * _round_up(max(cols, 1), _LANE) * itemsize


def _vmem_limit_bytes():
    """Per-generation scoped-VMEM limit: ~half of physical VMEM, clamped to [32, 96] MiB.

    v5e/v6e (128 MiB physical) -> 64 MiB; v7x (64 MiB per TensorCore) -> 32 MiB.
    """
    phys = 128 * 1024 * 1024
    try:
        info = pltpu.get_tpu_info()
        for attr in ("vmem_capacity_bytes", "vmem_size_bytes", "vmem_bytes"):
            val = getattr(info, attr, None)
            if val:
                phys = int(val)
                break
    except Exception:  # pragma: no cover - conservative fallback off-TPU / older APIs
        pass
    return int(min(96 << 20, max(32 << 20, phys // 2)))


def _compiler_params(vmem_limit):
    return pltpu.CompilerParams(
        dimension_semantics=("parallel",),   # batch tiles are independent (megacore on v7x)
        vmem_limit_bytes=int(vmem_limit),
    )


def _pick_batch_tile(b, per_sample_bytes, shared_bytes, vmem_limit):
    """Largest batch tile whose padded working set fits the VMEM budget, with >=2 grid steps."""
    budget = int(vmem_limit * _VMEM_FRACTION) - shared_bytes
    bt = max(1, budget // max(per_sample_bytes, 1))
    if b >= _MIN_GRID_STEPS:
        bt = min(bt, -(-b // _MIN_GRID_STEPS))   # cdiv: keep at least 2 grid steps
    return max(1, min(bt, b))


def _pad_batch(arrays, b, bt):
    """Zero-pad the leading batch dim up to a multiple of bt (benign through clamp/log)."""
    b_pad = -(-b // bt) * bt
    if b_pad == b:
        return tuple(arrays), b_pad
    pad = b_pad - b
    padded = tuple(jnp.pad(a, ((0, pad),) + ((0, 0),) * (a.ndim - 1)) for a in arrays)
    return padded, b_pad


# ----------------------------------------------------------------------------
# SPDTransform (first layer only):  X -> W^T X W
# ----------------------------------------------------------------------------
def _bimap_kernel(x_ref, wt_ref, o_ref):
    x = x_ref[...]                                    # (Bt, N, N), symmetric
    wt = wt_ref[...]                                  # (M, N) = W^T
    bt = x.shape[0]
    # W^T is broadcast across the batch tile: Mosaic's in-kernel dot_general needs
    # matching batch dims on both operands (see module docstring).  Its VMEM cost is
    # charged to the batch-tile budget in the wrapper.
    wtb = jnp.broadcast_to(wt[None], (bt,) + wt.shape).astype(_MXU_DTYPE)
    q = jnp.einsum("bai,bij->baj", wtb, x.astype(_MXU_DTYPE),
                   preferred_element_type=jnp.float32)            # W^T X       (Bt, M, N)
    o_ref[...] = jnp.einsum("baj,bcj->bac", q.astype(_MXU_DTYPE), wtb,
                            preferred_element_type=jnp.float32)   # (W^T X) W   (Bt, M, M)


def spd_transform(x, w):
    b, n, _ = x.shape
    m = w.shape[1]
    wt = jnp.transpose(w).astype(jnp.float32)          # tiny one-off XLA transpose
    vmem_limit = _vmem_limit_bytes()
    per_sample = (2 * (_padded_slab_bytes(n, n) + _padded_slab_bytes(m, m))  # dbl-buffered I/O
                  + 2 * _padded_slab_bytes(m, n))                            # wtb + q live values
    shared = 2 * _padded_slab_bytes(m, n)                                    # dbl-buffered W^T
    bt = _pick_batch_tile(b, per_sample, shared, vmem_limit)
    (xp,), b_pad = _pad_batch([x.astype(jnp.float32)], b, bt)
    cost = pl.CostEstimate(
        flops=int(2 * b_pad * (m * n * n + m * m * n)),
        transcendentals=0,
        bytes_accessed=int(4 * (b_pad * n * n + m * n + b_pad * m * m)),
    )
    out = pl.pallas_call(
        _bimap_kernel,
        out_shape=jax.ShapeDtypeStruct((b_pad, m, m), jnp.float32),
        grid=(b_pad // bt,),
        in_specs=[
            pl.BlockSpec((bt, n, n), lambda i: (i, 0, 0)),
            pl.BlockSpec((m, n), lambda i: (0, 0)),
        ],
        out_specs=pl.BlockSpec((bt, m, m), lambda i: (i, 0, 0)),
        compiler_params=_compiler_params(vmem_limit),
        cost_estimate=cost,
    )(xp, wt)
    return out[:b] if b_pad != b else out


# ----------------------------------------------------------------------------
# Fused SPDRectified + next SPDTransform:
#   W^T (U diag(max(d,eps)) U^T) W  ==  P diag(max(d,eps)) P^T   with  P = W^T U
# ----------------------------------------------------------------------------
def _rect_bimap_kernel(u_ref, d_ref, wt_ref, o_ref, *, eps):
    u = u_ref[...]                                    # (Bt, N, N)  columns = eigenvectors
    g = jnp.maximum(d_ref[...], eps)                  # (Bt, 1, N)  clamped eigenvalues
    wt = wt_ref[...]                                  # (M, N) = W^T
    bt = u.shape[0]
    wtb = jnp.broadcast_to(wt[None], (bt,) + wt.shape).astype(_MXU_DTYPE)   # see _bimap_kernel
    p = jnp.einsum("baj,bjk->bak", wtb, u.astype(_MXU_DTYPE),
                   preferred_element_type=jnp.float32)            # P = W^T U   (Bt, M, N)
    o_ref[...] = jnp.einsum("bak,bck->bac", (p * g).astype(_MXU_DTYPE), p.astype(_MXU_DTYPE),
                            preferred_element_type=jnp.float32)   # P diag(g) P^T
 

def rect_bimap(u, d, w, eps):
    b, n, _ = u.shape
    m = w.shape[1]
    wt = jnp.transpose(w).astype(jnp.float32)
    d3 = d.reshape(b, 1, n).astype(jnp.float32)
    vmem_limit = _vmem_limit_bytes()
    per_sample = (2 * (_padded_slab_bytes(n, n) + _padded_slab_bytes(1, n)
                       + _padded_slab_bytes(m, m))                           # dbl-buffered I/O
                  + 3 * _padded_slab_bytes(m, n))                            # wtb, p, p*g
    shared = 2 * _padded_slab_bytes(m, n)
    bt = _pick_batch_tile(b, per_sample, shared, vmem_limit)
    (up, dp), b_pad = _pad_batch([u.astype(jnp.float32), d3], b, bt)
    cost = pl.CostEstimate(
        flops=int(2 * b_pad * (m * n * n + m * m * n)),
        transcendentals=0,
        bytes_accessed=int(4 * (b_pad * n * n + b_pad * n + m * n + b_pad * m * m)),
    )
    out = pl.pallas_call(
        functools.partial(_rect_bimap_kernel, eps=eps),
        out_shape=jax.ShapeDtypeStruct((b_pad, m, m), jnp.float32),
        grid=(b_pad // bt,),
        in_specs=[
            pl.BlockSpec((bt, n, n), lambda i: (i, 0, 0)),
            pl.BlockSpec((bt, 1, n), lambda i: (i, 0, 0)),
            pl.BlockSpec((m, n), lambda i: (0, 0)),
        ],
        out_specs=pl.BlockSpec((bt, m, m), lambda i: (i, 0, 0)),
        compiler_params=_compiler_params(vmem_limit),
        cost_estimate=cost,
    )(up, dp, wt)
    return out[:b] if b_pad != b else out


# ----------------------------------------------------------------------------
# Fused SPDRectified + SPDTangentSpace + Normalize (single eigh feeds it):
#   T = U diag(log(max(d,eps))) U^T ;  out = T / || triu(T) ||_2
# ----------------------------------------------------------------------------
def _log_tangent_kernel(u_ref, d_ref, o_ref, *, eps, norm_eps):
    u = u_ref[...]                                    # (Bt, n, n)
    g = jnp.log(jnp.maximum(d_ref[...], eps))         # (Bt, 1, n)
    t = jnp.einsum("bik,bjk->bij", (u * g).astype(_MXU_DTYPE), u.astype(_MXU_DTYPE),
                   preferred_element_type=jnp.float32)            # U diag(g) U^T  (Bt, n, n)
    n = t.shape[-1]
    rows = jax.lax.broadcasted_iota(jnp.int32, (n, n), 0)
    cols = jax.lax.broadcasted_iota(jnp.int32, (n, n), 1)
    diag = (rows == cols).astype(jnp.float32)[None, :, :]          # (1, n, n) diagonal mask
    tsq = t * t
    fro2 = jnp.sum(jnp.sum(tsq, axis=2, keepdims=True), axis=1, keepdims=True)          # (Bt,1,1)
    dia2 = jnp.sum(jnp.sum(tsq * diag, axis=2, keepdims=True), axis=1, keepdims=True)   # (Bt,1,1)
    # For symmetric T: ||triu(T)||^2 = (||T||_F^2 + ||diag(T)||^2) / 2  (diag counted once).
    sumsq = 0.5 * (fro2 + dia2)
    inv = jax.lax.rsqrt(jnp.maximum(sumsq, norm_eps))              # EUP rsqrt, eps-guarded
    o_ref[...] = t * inv


def log_tangent(u, d, eps, norm_eps):
    b, n, _ = u.shape
    d3 = d.reshape(b, 1, n).astype(jnp.float32)
    vmem_limit = _vmem_limit_bytes()
    per_sample = (2 * (2 * _padded_slab_bytes(n, n) + _padded_slab_bytes(1, n))  # dbl-buffered I/O
                  + 2 * _padded_slab_bytes(n, n))                                # t, t*t live values
    shared = _padded_slab_bytes(n, n)                                            # diagonal mask
    bt = _pick_batch_tile(b, per_sample, shared, vmem_limit)
    (up, dp), b_pad = _pad_batch([u.astype(jnp.float32), d3], b, bt)
    cost = pl.CostEstimate(
        flops=int(2 * b_pad * n * n * n + 6 * b_pad * n * n),
        transcendentals=int(b_pad * n + b_pad),
        bytes_accessed=int(4 * (2 * b_pad * n * n + b_pad * n)),
    )
    out = pl.pallas_call(
        functools.partial(_log_tangent_kernel, eps=eps, norm_eps=norm_eps),
        out_shape=jax.ShapeDtypeStruct((b_pad, n, n), jnp.float32),
        grid=(b_pad // bt,),
        in_specs=[
            pl.BlockSpec((bt, n, n), lambda i: (i, 0, 0)),
            pl.BlockSpec((bt, 1, n), lambda i: (i, 0, 0)),
        ],
        out_specs=pl.BlockSpec((bt, n, n), lambda i: (i, 0, 0)),
        compiler_params=_compiler_params(vmem_limit),
        cost_estimate=cost,
    )(up, dp)
    return out[:b] if b_pad != b else out


# ----------------------------------------------------------------------------
# SPDNet parameters & forward
# ----------------------------------------------------------------------------
def init_spdnet_params(matrix_size, layer_num, key):
    """Deterministic semi-orthogonal Stiefel weights W_k of shape (in, out)."""
    out_sizes = [matrix_size // 2 ** i for i in range(layer_num)]
    weights = []
    in_size = matrix_size
    for out_size in out_sizes:
        key, sub = jax.random.split(key)
        a = jax.random.normal(sub, (in_size, out_size), dtype=jnp.float32)
        q, _ = jnp.linalg.qr(a)          # columns orthonormal
        weights.append(q.astype(jnp.float32))
        in_size = out_size
    return weights


def spdnet_forward(x, weights, eps=1e-4, norm_eps=1e-12):
    x = x.astype(jnp.float32)
    # First SPDTransform (nothing preceding to fuse with).
    x = spd_transform(x, weights[0])
    # Each remaining layer: ReEig of the current matrix fused with the NEXT BiMap.
    # TODO(synk): symmetric eigendecomposition has no Pallas primitive; eigh stays in plain JAX.
    for w in weights[1:]:
        evals, evecs = jnp.linalg.eigh(x)
        x = rect_bimap(evecs, evals, w, eps)
    # Tail: the last ReEig and the LogEig share the same eigenbasis, so one eigh
    # feeds a single fused rebuild + log + triu-norm + normalize kernel.
    evals, evecs = jnp.linalg.eigh(x)
    t = log_tangent(evecs, evals, eps, norm_eps)      # (B, n, n), already L2-normalized
    n = t.shape[-1]
    iu, ju = jnp.triu_indices(n)
    return t[:, iu, ju]                               # (B, n(n+1)/2) — tiny gather stays in XLA


def _spdnet_forward_ref(x, weights, eps=1e-4):
    """Unfused pure-JAX reference matching the PyTorch layer sequence."""
    x = x.astype(jnp.float32)
    for w in weights:
        x = jnp.einsum("ji,bjk,kl->bil", w, x, w)                       # BiMap
        d, u = jnp.linalg.eigh(x)
        x = jnp.einsum("bik,bk,bjk->bij", u, jnp.maximum(d, eps), u)    # ReEig
    d, u = jnp.linalg.eigh(x)
    x = jnp.einsum("bik,bk,bjk->bij", u, jnp.log(jnp.maximum(d, eps)), u)  # LogEig
    n = x.shape[-1]
    iu, ju = jnp.triu_indices(n)
    v = x[:, iu, ju]
    return v / jnp.linalg.norm(v, axis=-1, keepdims=True)


if __name__ == "__main__":
    key = jax.random.PRNGKey(0)
    kx, kp = jax.random.split(key)

    # Small shapes: batch=2, matrix_size=16, layer_num=3  -> out sizes [16, 8, 4]
    B, MATRIX_SIZE, LAYER_NUM = 2, 16, 3

    # Deterministic batch of SPD input matrices: A A^T / N + 1e-2 I
    a = jax.random.normal(kx, (B, MATRIX_SIZE, MATRIX_SIZE), dtype=jnp.float32)
    x = jnp.einsum("bij,bkj->bik", a, a) / MATRIX_SIZE \
        + 1e-2 * jnp.eye(MATRIX_SIZE, dtype=jnp.float32)[None]

    weights = init_spdnet_params(MATRIX_SIZE, LAYER_NUM, kp)

    out = spdnet_forward(x, weights)
    out = jax.block_until_ready(out)

    final_n = MATRIX_SIZE // 2 ** (LAYER_NUM - 1)               # 4
    expected_dim = final_n + final_n * (final_n - 1) // 2       # 10
    assert out.shape == (B, expected_dim), out.shape
    assert bool(jnp.all(jnp.isfinite(out)))

    ref = jax.block_until_ready(_spdnet_forward_ref(x, weights))
    assert jnp.allclose(out, ref, atol=5e-3, rtol=5e-3), float(jnp.max(jnp.abs(out - ref)))

    print("KERNEL_OK")
</pallas_src>

<mosaic_0001>
module attributes {stable_mosaic.version = 11 : i64} {
  func.func @_bimap_kernel(%arg0: i32, %arg1: memref<1x16x16xf32, #tpu.memory_space<vmem>>, %arg2: memref<16x16xf32, #tpu.memory_space<vmem>>, %arg3: memref<1x16x16xf32, #tpu.memory_space<vmem>>) attributes {dimension_semantics = [#tpu.dimension_semantics<parallel>], iteration_bounds = array<i64: 2>, scalar_prefetch = 0 : i64, scratch_operands = 0 : i64, tpu.core_type = #tpu.core_type<tc>, window_params = [{transform_indices = @transform_0, window_bounds = array<i64: 1, 16, 16>}, {pipeline_mode = #tpu.pipeline_mode<synchronous>, transform_indices = @transform_1, window_bounds = array<i64: 16, 16>}, {transform_indices = @transform_2, window_bounds = array<i64: 1, 16, 16>}]} {
    %c0 = arith.constant 0 : index
    %c0_0 = arith.constant 0 : index
    %c0_1 = arith.constant 0 : index
    %0 = vector.load %arg1[%c0, %c0_0, %c0_1] : memref<1x16x16xf32, #tpu.memory_space<vmem>>, vector<1x16x16xf32>
    %c0_2 = arith.constant 0 : index
    %c0_3 = arith.constant 0 : index
    %1 = vector.load %arg2[%c0_2, %c0_3] : memref<16x16xf32, #tpu.memory_space<vmem>>, vector<16x16xf32>
    %2 = vector.shape_cast %1 : vector<16x16xf32> to vector<1x16x16xf32>
    "tpu.trace_start"() <{level = 10 : i32, message = "bai,bij->baj"}> : () -> ()
    %cst = arith.constant dense<0.000000e+00> : vector<1x16x16xf32>
    %3 = tpu.matmul %2, %0, %cst {dimension_numbers = #tpu.dot_dimension_numbers<[2], [1], [1], [2], [0, 0, 0, 1, 1, 2], [0], [0]>} : vector<1x16x16xf32>, vector<1x16x16xf32>, vector<1x16x16xf32> -> vector<1x16x16xf32>
    "tpu.trace_stop"() : () -> ()
    "tpu.trace_start"() <{level = 10 : i32, message = "baj,bcj->bac"}> : () -> ()
    %cst_4 = arith.constant dense<0.000000e+00> : vector<1x16x16xf32>
    %4 = tpu.matmul %3, %2, %cst_4 {dimension_numbers = #tpu.dot_dimension_numbers<[2], [2], [1], [1], [0, 0, 0, 1, 1, 1], [0], [0]>} : vector<1x16x16xf32>, vector<1x16x16xf32>, vector<1x16x16xf32> -> vector<1x16x16xf32>
    "tpu.trace_stop"() : () -> ()
    %c0_5 = arith.constant 0 : index
    %c0_6 = arith.constant 0 : index
    %c0_7 = arith.constant 0 : index
    %5 = vector.load %arg3[%c0_5, %c0_6, %c0_7] : memref<1x16x16xf32, #tpu.memory_space<vmem>>, vector<1x16x16xf32>
    tpu.vector_store %arg3[%c0_5, %c0_6, %c0_7], %4 {strides = array<i32>} : memref<1x16x16xf32, #tpu.memory_space<vmem>>, vector<1x16x16xf32>,
    return
  }
  func.func @transform_0(%arg0: i32) -> (i32, i32, i32) {
    %c0_i32 = arith.constant 0 : i32
    %c0_i32_0 = arith.constant 0 : i32
    %c0_i32_1 = arith.constant 0 : i32
    return %arg0, %c0_i32, %c0_i32_0 : i32, i32, i32
  }
  func.func @transform_1(%arg0: i32) -> (i32, i32) {
    %c0_i32 = arith.constant 0 : i32
    %c0_i32_0 = arith.constant 0 : i32
    %c0_i32_1 = arith.constant 0 : i32
    return %c0_i32, %c0_i32_0 : i32, i32
  }
  func.func @transform_2(%arg0: i32) -> (i32, i32, i32) {
    %c0_i32 = arith.constant 0 : i32
    %c0_i32_0 = arith.constant 0 : i32
    %c0_i32_1 = arith.constant 0 : i32
    return %arg0, %c0_i32, %c0_i32_0 : i32, i32, i32
  }
}

</mosaic_0001>

<bundles_post_ra>
// kernel: tpu_custom_call.1
= control target key start
LH: loop header
LB: loop body
LE: loop exit
PB: predicated region body
PF: predicated region fallthrough
CT: control target
= control target key end

     0   :  { %7 = vsyncpa [#allocation3], 0  ;;  %s889_s0 = inlined_call_operand.hbm [shape: f32[2,16,16], index: 0, kind: input, shape index: {}]   ;;  %s890_s1 = inlined_call_operand.hbm [shape: f32[16,16], index: 1, kind: input, shape index: {}]   ;;  %s891_s2 = inlined_call_operand.hbm [shape: f32[2,16,16], index: 2, kind: output, shape index: {}]  }
   0x1   :  { %9 = vsyncpa [#allocation3 + $0x1], 0 }
   0x2   :  { %10 = vsyncpa [#allocation6], 0 }
   0x3   :  { %11 = vsyncpa [#allocation4], 0 }
   0x4   :  { %13 = vsyncpa [#allocation4 + $0x1], 0  ;;  %s696_s9 = smov 0   ;;  %s698_s10 = smov 0  }
   0x5   :  { %s700_s11 = smov 0   ;;  %s702_s12 = smov 0  }
   0x6 LB: > { %s717_s13 = sadd.s32 4294967295, %s672_s12   ;;  %s443_s14 = sadd.s32 4294967294, %s672_s12   ;;  %s672_s12 = sphi %s702_s12, %s913_s12   ;;  %s668_s11 = sphi %s700_s11, %s912_s11   ;;  %s664_s10 = sphi %s698_s10, %s911_s10   ;;  %s660_s9 = sphi %s696_s9, %s910_s9  }
   0x7   : > { %p39_p0 = scmp.ne.s32.totalorder %s664_s10, %s660_s9  ;;  %p892_p1 = scmp.eq.s32.totalorder %s717_s13, 0 }
   0x8   : > { %p90_p3 = scmp.eq.s32.totalorder %s443_s14, 1  ;;  %p444_p5 = scmp.ge.s32.totalorder %s672_s12, 1 }
   0x9   : > { %p726_p4 = por %p892_p1, %p39_p0  ;;  %p97_p7 = scmp.lt.s32.totalorder %s672_s12, 3 }
   0xa   : > { %p731_p6 = por %p90_p3, %p39_p0  ;;  %s674_s18 = smov [#allocation5]  }
   0xb   : > { %s896_s15 = scalar_select %p726_p4, 1, 0 }
   0xc   : > { %s897_s16 = scalar_select %p731_p6, 1, 0 }
   0xd   : > { %p736_p8 = pnand %p444_p5, %p97_p7  ;;  %s109_s19 = sshll.u32 %s674_s18, 4  ;;  %s110_s19 = int_to_ptr.vmem [resolvable:$true] %s109_s19 }
   0xe   : > { %s750_s21 = sadd.s32 1, %s672_s12   ;;  %s26_s22 = sadd.s32 1, %s668_s11 }
   0xf   : > { %s898_s17 = scalar_select %p736_p8, 1, 0 }
  0x10   : > { %p497_p9 = pneg %p736_p8  ;;  %s23_s23 = ssub.s32 %s672_s12, %s750_s21 }
  0x11   : > { %s561_s24 = scalar_lea.vmem %s110_s19, 256  ;;  %p569_p5 = scmp.lt.s32.totalorder %s110_s19, %s110_s19 }
  0x12   : > { %p745_p11 = pnand %p497_p9, %p892_p1  ;;  %p562_p13 = scmp.ne.s32.totalorder %s110_s19, %s561_s24 }
  0x13   : > { %p570_p7 = scmp.lt.s32.totalorder %s561_s24, %s561_s24 }
  0x14   : > { %p552_p12 = pneg %p745_p11 }
  0x15   : > { %p571_p10 = por %p570_p7, %p569_p5 }
  0x16   : > { %p564_p0 = pnand %p562_p13, %p552_p12 }
  0x18   : > { %p565_p3 = pneg %p564_p0 }
  0x1a   : > { %p572_p2 = pnand %p571_p10, %p565_p3 }
  0x1c   : > { %575 = shalt.err (!%p572_p2)
}
  0x1d   : > { %s675_s25 = smov 128   ;;  %s676_s26 = smov 8  }
  0x1e   : > { %500 = dma.hbm_to_vmem [thread:$0]  (!%p745_p11), %s890_s1, 256, %s110_s19, [#allocation6], %s675_s25, %s675_s25, %s676_s26  }
  0x1f   : > { %p24_p2 = scmp.eq.s32.totalorder %s23_s23, 0  ;;  %p33_p9 = scmp.ne.s32.totalorder %s668_s11, %s664_s10 }
  0x20   : > { %p34_p10 = scmp.eq.s32.totalorder %s672_s12, 0  ;;  %p510_p12 = scmp.lt.s32.totalorder %s672_s12, 2 }
  0x21   : > { %s770_s29 = scalar_select %p24_p2, %s668_s11, %s26_s22  }
  0x22   : > { %p35_p13 = por %p34_p10, %p33_p9  ;;  %p900_p0 = scmp.eq.s32.totalorder %s717_s13, 1 }
  0x23   : > { %s123_s3 = sand.u32 1, %s668_s11   ;;  %s465_s4 = sshll.u32 %s672_s12, 8 }
  0x24   : > { %p774_p3 = por %p900_p0, %p33_p9  ;;  %s447_s5 = sshll.u32 %s123_s3, 4 }
  0x25   : > { %s783_s8 = scalar_lea.hbm %s889_s0, %s465_s4  ;;  %s127_s14 = scalar_lea.vmem [#allocation2], %s447_s5 }
  0x26   : > { %s901_s30 = scalar_select %p774_p3, 1, 0 }
  0x27   : > { %s134_s18 = sshll.u32 %s127_s14, 4  ;;  %p785_p11 = pnand %p510_p12, %p35_p13  ;;  %s789_s18 = int_to_ptr.vmem [resolvable:$true] %s134_s18 }
  0x28   : > { %s791_s20 = scalar_lea.sflag [#allocation3], %s123_s3  ;;  %s576_s22 = scalar_lea.hbm %s783_s8, 256 }
  0x29   : > { %p577_p5 = scmp.ne.s32.totalorder %s783_s8, %s576_s22  ;;  %p578_p7 = pneg %p785_p11 }
  0x2a   : > { %s581_s27 = scalar_lea.hbm %s889_s0, 512  ;;  %p582_p10 = scmp.lt.s32.totalorder %s783_s8, %s889_s0 }
  0x2b   : > { %p579_p2 = pnand %p578_p7, %p577_p5  ;;  %p583_p12 = scmp.lt.s32.totalorder %s581_s27, %s576_s22 }
  0x2d   : > { %p580_p9 = pneg %p579_p2  ;;  %p584_p13 = por %p583_p12, %p582_p10 }
  0x2f   : > { %p585_p0 = pnand %p584_p13, %p580_p9 }
  0x31   : > { %588 = shalt.err (!%p585_p0)
}
  0x32   : > { %s589_s3 = scalar_lea.vmem %s789_s18, 256  ;;  %s677_s5 = smov [#allocation2]  }
  0x33   : > { %p590_p1 = scmp.ne.s32.totalorder %s789_s18, %s589_s3  ;;  %s594_s6 = sshll.u32 %s677_s5, 4  ;;  %s595_s6 = int_to_ptr.vmem [resolvable:$false] %s594_s6 }
  0x34   : > { %s596_s7 = scalar_lea.vmem %s595_s6, 512  ;;  %p597_p2 = scmp.lt.s32.totalorder %s789_s18, %s595_s6 }
  0x35   : > { %p592_p6 = pnand %p590_p1, %p578_p7  ;;  %p598_p3 = scmp.lt.s32.totalorder %s596_s7, %s589_s3 }
  0x37   : > { %p593_p5 = pneg %p592_p6  ;;  %p599_p4 = por %p598_p3, %p597_p2 }
  0x39   : > { %p600_p8 = pnand %p599_p4, %p593_p5 }
  0x3b   : > { %603 = shalt.err (!%p600_p8)
}
  0x3c   : > { %504 = dma.hbm_to_vmem [thread:$0]  (!%p785_p11), %s783_s8, 256, %s789_s18, %s791_s20, %s675_s25, %s675_s25, %s676_s26  }
  0x3d   : > { %p903_p1 = scmp.ne.s32.totalorder %s898_s17, 0 }
  0x3e   : > { %s818_s14 = sand.u32 (!%p903_p1), 1, %s664_s10   ;;  %p904_p4 = scmp.ne.s32.totalorder (!%p903_p1), %s896_s15, 0 }
  0x3f   : > { %146 = sbr.rel (%p903_p1) target bundleno = 482 (0x1e2), region = 28  ;;  %s451_s22 = sshll.u32 (!%p903_p1), %s818_s14, 4 }
  0x40   : > { %s149_s23 = scalar_lea.sflag (!%p903_p1), [#allocation3], %s818_s14  ;;  %s152_s24 = scalar_lea.vmem (!%p903_p1), [#allocation2], %s451_s22 }
  0x44   : > { %647 = dma.done.wait (%p904_p4), %s149_s23, 256  }
  0x45   : > { %649 = vsyncadd (%p904_p4), %s149_s23, 4294967040  ;;  %p905_p6 = scmp.eq.s32.totalorder %s717_s13, 0 }
  0x47   : > { %651 = dma.done.wait (%p905_p6), [#allocation6], 256   ;;  %p906_p8 = pmov %p905_p6 }
  0x48   : > { %vm181_vm0 = vcmask 130048   ;;  %v178_v0 = vld [vmem:[%s152_s24 + $0x8] sm:$0xff]  ;;  %v177_v1 = vld [vmem:[%s152_s24] sm:$0xff]  ;;  %s176_s15 = scalar_lea.vmem [#allocation7], %s451_s22  ;;  %s466_s25 = sshll.u32 %s717_s13, 8 }
  0x49   : > { %653 = vsyncadd (%p906_p8), [#allocation6], 4294967040  ;;  %v179_v2 = vld [vmem:[#allocation5] sm:$0xff]  ;;  %475 = vmatprep.subr.mxu0 %v178_v0  ;;  %v180_v3 = vld [vmem:[#allocation5 + $0x8] sm:$0xff]  ;;  %s360_s17 = sshll.u32 %s176_s15, 4  ;;  %s844_s18 = scalar_lea.hbm %s891_s2, %s466_s25  ;;  %s839_s17 = int_to_ptr.vmem [resolvable:$true] %s360_s17 }
  0x4a   : > { %479 = vmatprep.mubr.msk.f32.mxu0 %vm181_vm0, %v179_v2  ;;  %476 = vmatpush3.msra.mxu0 %v178_v0  ;;  %s347_s19 = scalar_lea.sflag [#allocation4], %s818_s14  ;;  %s604_s20 = scalar_lea.vmem %s839_s17, 256 }
  0x4b   : > { %482 = vmatprep.subr.msk.mxu1 %vm181_vm0, %v180_v3  ;;  %477 = vmatprep.subr.mxu0 %v177_v1  ;;  %p605_p3 = scmp.ne.s32.totalorder %s839_s17, %s604_s20  ;;  %p907_p11 = scmp.ne.s32.totalorder %s901_s30, 0 }
  0x4c   : > { %483 = vmatpush3.xpose.msk.msra.mxu1 %vm181_vm0, %v180_v3  ;;  %478 = vmatpush3.msra.mxu0 %v177_v1  ;;  %s678_s13 = smov [#allocation7]  }
  0x4d   : > { %484 = vmatprep.subr.msk.mxu1 %vm181_vm0, %v179_v2  ;;  %480 = vmatmul.mubr.msk.f32.vlgmr.msra.gmra.mxu0 %vm181_vm0, %v180_v3  ;;  %p606_p7 = pnand %p605_p3, %p907_p11  ;;  %s608_s27 = sshll.u32 %s678_s13, 4  ;;  %s609_s27 = int_to_ptr.vmem [resolvable:$false] %s608_s27 }
  0x4e   : > { %s610_s28 = scalar_lea.vmem %s609_s27, 512  ;;  %p611_p10 = scmp.lt.s32.totalorder %s839_s17, %s609_s27 }
  0x4f   : > { %p607_p9 = pneg %p606_p7  ;;  %p612_p12 = scmp.lt.s32.totalorder %s610_s28, %s604_s20 }
  0x50   : > { %485 = vmatpush3.xpose.msk.msra.mxu1 %vm181_vm0, %v179_v2 }
  0x51   : > { %p613_p13 = por %p612_p12, %p611_p10 }
  0x53   : > { %p614_p0 = pnand %p613_p13, %p607_p9 }
 0x10d   : > { %v481_v4 = vpop.f32.mrf.mxu0 }
 0x10f   : > { %v254_v5 = vpop.f32.mrf.mxu0 }
 0x110   : > { %486 = vmatprep.mubr.msk.f32.mxu1 %vm181_vm0, %v254_v5 }
 0x111   : > { %487 = vmatmul.mubr.msk.f32.vlgmr.msra.gmra.mxu1 %vm181_vm0, %v481_v4 }
 0x1d1   : > { %v488_v6 = vpop.f32.mrf.mxu1 }
 0x1d2   : > { %345 = vst.msk [vmem:[%s176_s15 + $0x8] sm:$0xff] %vm181_vm0, %v488_v6 }
 0x1d3   : > { %v335_v7 = vpop.f32.mrf.mxu1 }
 0x1d4   : > { %344 = vst.msk [vmem:[%s176_s15] sm:$0xff] %vm181_vm0, %v335_v7 }
 0x1d5   : > { %617 = shalt.err (!%p614_p0)
}
 0x1d6   : > { %s618_s4 = scalar_lea.hbm %s844_s18, 256  ;;  %s622_s6 = scalar_lea.hbm %s891_s2, 512 }
 0x1d7   : > { %p619_p5 = scmp.ne.s32.totalorder %s844_s18, %s618_s4  ;;  %p623_p4 = scmp.lt.s32.totalorder %s844_s18, %s891_s2 }
 0x1d8   : > { %p624_p6 = scmp.lt.s32.totalorder %s622_s6, %s618_s4 }
 0x1d9   : > { %p620_p2 = pnand %p619_p5, %p907_p11 }
 0x1da   : > { %p625_p8 = por %p624_p6, %p623_p4 }
 0x1db   : > { %p621_p1 = pneg %p620_p2 }
 0x1dd   : > { %p626_p3 = pnand %p625_p8, %p621_p1 }
 0x1df   : > { %629 = shalt.err (!%p626_p3)
}
 0x1e0   : > { %s679_s23 = smov 128   ;;  %s680_s24 = smov 8  }
 0x1e1   : > { %495 = dma.vmem_to_hbm [thread:$0]  (%p907_p11), %s839_s17, 256, %s844_s18, %s347_s19, %s679_s23, %s679_s23, %s680_s24  }
 0x1e2 PF: > { %s375_s15 = sand.u32 1, %s660_s9   ;;  %p908_p7 = scmp.ne.s32.totalorder %s897_s16, 0 }
 0x1e3   : > { %p909_p9 = scmp.ge.s32.totalorder %s672_s12, 2  ;;  %s376_s25 = scalar_lea.sflag [#allocation4], %s375_s15 }
 0x1e5   : > { %p506_p10 = pnand %p909_p9, %p908_p7 }
 0x1e7   : > { %p507_p12 = pneg %p506_p10 }
 0x1e9   : > { %655 = dma.done.wait (%p507_p12), %s376_s25, 256  }
 0x1ea   : > { %657 = vsyncadd (%p507_p12), %s376_s25, 4294967040  ;;  %p16_p13 = scmp.ge.s32.totalorder %s750_s21, 4   ;;  %s910_s9 = smov %s664_s10 }
 0x1eb   : > { %s911_s10 = smov %s668_s11  ;;  %s912_s11 = smov %s770_s29 }
 0x1ec   : > { %s913_s12 = smov %s750_s21  ;;  %18 = sbr.rel (!%p16_p13) target bundleno = 6 (0x6), region = 77 }
 0x1f1   :  { %381 = vsyncpa [#allocation3], 1 }
 0x1f2   :  { %383 = vsyncpa [#allocation3 + $0x1], 1 }
 0x1f3   :  { %384 = vsyncpa [#allocation6], 1 }
 0x1f4   :  { %385 = vsyncpa [#allocation4], 1 }
 0x1f5   :  { %387 = vsyncpa [#allocation4 + $0x1], 1 }

</bundles_post_ra>
